<compile_context>
chip_gen: v5e
topology: v5e:2x2
jax: 0.10.0
libtpu: 0.0.40
codegen_flags: <defaults>
</compile_context>

<pallas_src>
import functools
import math

import jax
import jax.numpy as jnp
from jax import lax
from jax.experimental import pallas as pl
from jax.experimental.pallas import tpu as pltpu


_NEG_BIG = -1e30  # finite "-inf" for masked (padded) key columns


def _flash_sdpa_kernel(q_ref, k_ref, v_ref, o_ref, m_sc, l_sc, acc_sc, q_sc, *,
                       scale, lk_valid, tk, needs_mask, mxu_dtype):
    """One (batch, q-tile, kv-tile) grid step of online-softmax attention.

    q_ref: (tq, D)   k_ref: (tk, D)   v_ref: (tk, Dv)   o_ref: (tq, Dv)
    m_sc/l_sc: (tq, 1) f32   acc_sc: (tq, Dv) f32   q_sc: (tq, D) mxu_dtype
    """
    kv = pl.program_id(2)
    last_kv = pl.num_programs(2) - 1

    @pl.when(kv == 0)
    def _init():
        m_sc[...] = jnp.full(m_sc.shape, -jnp.inf, dtype=m_sc.dtype)
        l_sc[...] = jnp.zeros(l_sc.shape, dtype=l_sc.dtype)
        acc_sc[...] = jnp.zeros(acc_sc.shape, dtype=acc_sc.dtype)
        # Hoisted per-q-tile: fold 1/sqrt(D) into Q once (not once per kv step).
        # `scale` is a Python float -> weak-typed, no silent f32 promotion of bf16.
        q_sc[...] = (q_ref[...] * scale).astype(q_sc.dtype)

    k = k_ref[...]
    if k.dtype != mxu_dtype:
        k = k.astype(mxu_dtype)

    # score tile: contract D with D directly -> (tq, tk); f32 accumulation on MXU.
    s = lax.dot_general(q_sc[...], k,
                        dimension_numbers=(((1,), (1,)), ((), ())),
                        preferred_element_type=jnp.float32)

    def _update(s_tile, v_tile):
        # Online (streaming) softmax update (f32 bookkeeping on all generations).
        m_prev = m_sc[...]
        m_new = jnp.maximum(m_prev, jnp.max(s_tile, axis=-1, keepdims=True))
        alpha = jnp.exp(m_prev - m_new)                 # rescale of old state
        p = jnp.exp(s_tile - m_new)                     # (tq, tk) f32
        l_sc[...] = alpha * l_sc[...] + jnp.sum(p, axis=-1, keepdims=True)
        acc_sc[...] = alpha * acc_sc[...] + jnp.dot(
            p.astype(v_tile.dtype), v_tile, preferred_element_type=jnp.float32)
        m_sc[...] = m_new

    if needs_mask:
        # Only the LAST kv tile can contain padded key columns -> gate all mask
        # work to that single step; interior steps run the plain path.
        @pl.when(kv == last_kv)
        def _masked():
            rem = lk_valid - kv * tk                    # valid keys in this tile
            col = lax.broadcasted_iota(jnp.int32, s.shape, 1)
            s_m = jnp.where(col < rem, s, _NEG_BIG)
            v = v_ref[...]
            if v.dtype != mxu_dtype:
                v = v.astype(mxu_dtype)
            # Explicitly zero out-of-bounds V rows (boundary-block contents are
            # unspecified; protects acc from NaN/inf garbage even though p==0).
            row = lax.broadcasted_iota(jnp.int32, v.shape, 0)
            v = jnp.where(row < rem, v, 0.0)
            _update(s_m, v)

        @pl.when(kv != last_kv)
        def _plain():
            v = v_ref[...]
            if v.dtype != mxu_dtype:
                v = v.astype(mxu_dtype)
            _update(s, v)
    else:
        v = v_ref[...]
        if v.dtype != mxu_dtype:
            v = v.astype(mxu_dtype)
        _update(s, v)

    @pl.when(kv == last_kv)
    def _finalize():
        # Exact divide: runs once per q-tile, off the critical path, and keeps
        # closer parity with the PyTorch softmax than the approx reciprocal.
        o_ref[...] = (acc_sc[...] / l_sc[...]).astype(o_ref.dtype)


def scaled_dot_product_attention(query, key, value, *, block_q=256, block_k=512,
                                 mxu_dtype=None):
    """query: (B, Lq, D), key: (B, Lk, D), value: (B, Lk, Dv) -> (B, Lq, Dv).

    block_q / block_k: q / kv tile sizes.  Defaults (256 / 512) keep K/V HBM
      re-reads low and amortize per-grid-step overhead while staying a few MiB
      of VMEM even on v7x (64 MiB).  block_k can be raised to 1024 for long Lk
      on v5e/v6e.
    mxu_dtype: dtype used for the QK / PV matmul operands (accumulation stays
      f32).  Pass jnp.bfloat16 on v6e/v7x when inputs are f32 for 2-4x MXU
      throughput; default None keeps the input dtype (exact parity).
    If used per-head with Dv < 128, fold heads caller-side so the output last
    dim is lane-dense (multiple of 128).
    """
    B, Lq, D = query.shape
    Bk, Lk, Dk = key.shape
    Bv, Lv, Dv = value.shape
    assert (Bk, Dk) == (B, D) and (Bv, Lv) == (B, Lk)

    if mxu_dtype is None:
        mxu_dtype = query.dtype
    mxu_dtype = jnp.dtype(mxu_dtype)

    scale = 1.0 / math.sqrt(D)   # keep as Python float (weak-typed)

    # ---- q tiling (ragged tails handled by Pallas partial boundary blocks) ----
    tq = Lq if Lq <= block_q else block_q
    # v7x megacore: keep at least 2 "parallel" grid units so both TensorCores
    # get work (single-TC v5e/v6e are unaffected).
    if B * pl.cdiv(Lq, tq) < 2 and Lq >= 16:
        tq = max(8, ((Lq // 2 + 7) // 8) * 8)

    # ---- kv tiling: padded key columns of the last tile are masked in-kernel ----
    tk = Lk if Lk <= block_k else block_k
    needs_mask = (Lk % tk) != 0

    n_q_tiles = pl.cdiv(Lq, tq)
    grid = (B, n_q_tiles, pl.cdiv(Lk, tk))

    kernel = functools.partial(
        _flash_sdpa_kernel, scale=scale, lk_valid=Lk, tk=tk,
        needs_mask=needs_mask, mxu_dtype=mxu_dtype)

    in_item = jnp.dtype(query.dtype).itemsize
    mxu_item = mxu_dtype.itemsize

    # Advisory cost estimate — includes the K/V refetch factor (ceil(Lq/tq)).
    cost = pl.CostEstimate(
        flops=2 * B * Lq * Lk * D + 2 * B * Lq * Lk * Dv,
        transcendentals=B * Lq * Lk,
        bytes_accessed=(query.size + B * Lq * Dv) * in_item
                       + (key.size + value.size) * in_item * int(n_q_tiles),
    )

    # Rough per-core VMEM footprint: double-buffered Q/K/V/O tiles + scratch
    # (m, l, acc, q_sc) + the (tq, tk) f32 s/p intermediates.  Only raise the
    # scoped VMEM limit when the default (16 MiB on v5e) would be too small;
    # cap at 64 MiB so v7x (64 MiB physical) is never overcommitted.
    vmem_est = (2 * (tq * D + tk * D + tk * Dv) * in_item
                + 2 * tq * Dv * in_item
                + tq * Dv * 4 + tq * D * mxu_item + 2 * tq * 4
                + 2 * tq * tk * 4)
    vmem_limit = int(min(2 * vmem_est, 64 << 20)) if vmem_est > (14 << 20) else None

    out = pl.pallas_call(
        kernel,
        out_shape=jax.ShapeDtypeStruct((B, Lq, Dv), query.dtype),
        grid_spec=pltpu.PrefetchScalarGridSpec(
            num_scalar_prefetch=0,
            grid=grid,
            in_specs=[
                # leading batch dim squeezed -> 2-D refs inside the kernel
                pl.BlockSpec((None, tq, D), lambda b, qi, ki: (b, qi, 0)),
                # NOTE: if the profile shows exposed K/V DMA at q-tile
                # transitions, add pipeline_mode=pl.Buffered(3) to K/V specs.
                pl.BlockSpec((None, tk, D), lambda b, qi, ki: (b, ki, 0)),
                pl.BlockSpec((None, tk, Dv), lambda b, qi, ki: (b, ki, 0)),
            ],
            # same output block across the kv axis -> accumulator-resident output
            out_specs=pl.BlockSpec((None, tq, Dv), lambda b, qi, ki: (b, qi, 0)),
            scratch_shapes=[
                pltpu.VMEM((tq, 1), jnp.float32),    # running max m
                pltpu.VMEM((tq, 1), jnp.float32),    # running denom l
                pltpu.VMEM((tq, Dv), jnp.float32),   # f32 output accumulator
                pltpu.VMEM((tq, D), mxu_dtype),      # pre-scaled (and pre-cast) Q
            ],
        ),
        compiler_params=pltpu.CompilerParams(
            dimension_semantics=("parallel", "parallel", "arbitrary"),
            vmem_limit_bytes=vmem_limit,
        ),
        cost_estimate=cost,
    )(query, key, value)

    return out


def _reference(query, key, value):
    # pure-JAX reference mirroring the PyTorch module exactly
    D = query.shape[-1]
    score = jnp.einsum("bqd,bkd->bqk", query, key) / jnp.sqrt(jnp.float32(D))
    attn = jax.nn.softmax(score, axis=-1)
    return jnp.einsum("bqk,bkd->bqd", attn, value)


if __name__ == "__main__":
    root = jax.random.PRNGKey(0)

    # --- check 1: small shapes consistent with the module (single-tile path) ---
    B, Lq, Lk, D = 2, 8, 8, 32
    kq, kk, kv_ = jax.random.split(root, 3)
    query = jax.random.normal(kq, (B, Lq, D), dtype=jnp.float32)
    key_t = jax.random.normal(kk, (B, Lk, D), dtype=jnp.float32)
    value = jax.random.normal(kv_, (B, Lk, D), dtype=jnp.float32)

    ctx = jax.block_until_ready(scaled_dot_product_attention(query, key_t, value))
    ref = _reference(query, key_t, value)
    assert ctx.shape == (B, Lq, D)
    assert jnp.allclose(ctx, ref, atol=2e-3, rtol=2e-3), float(
        jnp.max(jnp.abs(ctx - ref)))

    # --- check 2: multi-tile online-softmax + ragged-key path (partial last kv
    #     block, no wrapper-side padding) ---
    B2, Lq2, Lk2, D2 = 2, 16, 24, 32
    kq2, kk2, kv2 = jax.random.split(jax.random.PRNGKey(1), 3)
    q2 = jax.random.normal(kq2, (B2, Lq2, D2), dtype=jnp.float32)
    k2 = jax.random.normal(kk2, (B2, Lk2, D2), dtype=jnp.float32)
    v2 = jax.random.normal(kv2, (B2, Lk2, D2), dtype=jnp.float32)

    ctx2 = jax.block_until_ready(
        scaled_dot_product_attention(q2, k2, v2, block_q=8, block_k=16))
    ref2 = _reference(q2, k2, v2)
    assert ctx2.shape == (B2, Lq2, D2)
    assert jnp.allclose(ctx2, ref2, atol=2e-3, rtol=2e-3), float(
        jnp.max(jnp.abs(ctx2 - ref2)))

    # --- check 3: bf16-on-MXU perf knob (v6e/v7x); looser tolerance ---
    ctx3 = jax.block_until_ready(
        scaled_dot_product_attention(q2, k2, v2, block_q=8, block_k=16,
                                     mxu_dtype=jnp.bfloat16))
    assert ctx3.shape == (B2, Lq2, D2)
    assert jnp.allclose(ctx3, ref2, atol=5e-2, rtol=5e-2), float(
        jnp.max(jnp.abs(ctx3 - ref2)))

    print("KERNEL_OK")
</pallas_src>

<mosaic_0001>
module attributes {stable_mosaic.version = 11 : i64} {
  func.func @_flash_sdpa_kernel(%arg0: i32, %arg1: i32, %arg2: i32, %arg3: memref<1x8x32xf32, #tpu.memory_space<vmem>>, %arg4: memref<1x8x32xf32, #tpu.memory_space<vmem>>, %arg5: memref<1x8x32xf32, #tpu.memory_space<vmem>>, %arg6: memref<1x8x32xf32, #tpu.memory_space<vmem>>, %arg7: memref<8x1xf32, #tpu.memory_space<vmem>>, %arg8: memref<8x1xf32, #tpu.memory_space<vmem>>, %arg9: memref<8x32xf32, #tpu.memory_space<vmem>>, %arg10: memref<8x32xf32, #tpu.memory_space<vmem>>) attributes {dimension_semantics = [#tpu.dimension_semantics<parallel>, #tpu.dimension_semantics<parallel>, #tpu.dimension_semantics<arbitrary>], iteration_bounds = array<i64: 2, 1, 1>, scalar_prefetch = 0 : i64, scratch_operands = 4 : i64, tpu.core_type = #tpu.core_type<tc>, window_params = [{transform_indices = @transform_0, window_bounds = array<i64: 1, 8, 32>}, {transform_indices = @transform_1, window_bounds = array<i64: 1, 8, 32>}, {transform_indices = @transform_2, window_bounds = array<i64: 1, 8, 32>}, {transform_indices = @transform_3, window_bounds = array<i64: 1, 8, 32>}]} {
    %c0_i32 = arith.constant 0 : i32
    %0 = arith.cmpi eq, %arg2, %c0_i32 : i32
    %1 = arith.extui %0 : i1 to i32
    %c0_i32_0 = arith.constant 0 : i32
    %2 = arith.cmpi ne, %1, %c0_i32_0 : i32
    scf.if %2 {
      %cst_25 = arith.constant 0xFF800000 : f32
      %34 = vector.broadcast %cst_25 : f32 to vector<8x1xf32>
      %c0_26 = arith.constant 0 : index
      %c0_27 = arith.constant 0 : index
      %35 = vector.load %arg7[%c0_26, %c0_27] : memref<8x1xf32, #tpu.memory_space<vmem>>, vector<8x1xf32>
      tpu.vector_store %arg7[%c0_26, %c0_27], %34 {strides = array<i32>} : memref<8x1xf32, #tpu.memory_space<vmem>>, vector<8x1xf32>,
      %cst_28 = arith.constant 0.000000e+00 : f32
      %36 = vector.broadcast %cst_28 : f32 to vector<8x1xf32>
      %c0_29 = arith.constant 0 : index
      %c0_30 = arith.constant 0 : index
      %37 = vector.load %arg8[%c0_29, %c0_30] : memref<8x1xf32, #tpu.memory_space<vmem>>, vector<8x1xf32>
      tpu.vector_store %arg8[%c0_29, %c0_30], %36 {strides = array<i32>} : memref<8x1xf32, #tpu.memory_space<vmem>>, vector<8x1xf32>,
      %cst_31 = arith.constant 0.000000e+00 : f32
      %38 = vector.broadcast %cst_31 : f32 to vector<8x32xf32>
      %c0_32 = arith.constant 0 : index
      %c0_33 = arith.constant 0 : index
      %39 = vector.load %arg9[%c0_32, %c0_33] : memref<8x32xf32, #tpu.memory_space<vmem>>, vector<8x32xf32>
      tpu.vector_store %arg9[%c0_32, %c0_33], %38 {strides = array<i32>} : memref<8x32xf32, #tpu.memory_space<vmem>>, vector<8x32xf32>,
      %c0_34 = arith.constant 0 : index
      %c0_35 = arith.constant 0 : index
      %c0_36 = arith.constant 0 : index
      %40 = vector.load %arg3[%c0_34, %c0_35, %c0_36] : memref<1x8x32xf32, #tpu.memory_space<vmem>>, vector<1x8x32xf32>
      %41 = vector.shape_cast %40 : vector<1x8x32xf32> to vector<8x32xf32>
      %cst_37 = arith.constant 0.176776692 : f32
      %42 = vector.broadcast %cst_37 : f32 to vector<8x32xf32>
      %43 = arith.mulf %41, %42 : vector<8x32xf32>
      %c0_38 = arith.constant 0 : index
      %c0_39 = arith.constant 0 : index
      %44 = vector.load %arg10[%c0_38, %c0_39] : memref<8x32xf32, #tpu.memory_space<vmem>>, vector<8x32xf32>
      tpu.vector_store %arg10[%c0_38, %c0_39], %43 {strides = array<i32>} : memref<8x32xf32, #tpu.memory_space<vmem>>, vector<8x32xf32>,
    } else {
    }
    %c0 = arith.constant 0 : index
    %c0_1 = arith.constant 0 : index
    %c0_2 = arith.constant 0 : index
    %3 = vector.load %arg4[%c0, %c0_1, %c0_2] : memref<1x8x32xf32, #tpu.memory_space<vmem>>, vector<1x8x32xf32>
    %4 = vector.shape_cast %3 : vector<1x8x32xf32> to vector<8x32xf32>
    %c0_3 = arith.constant 0 : index
    %c0_4 = arith.constant 0 : index
    %5 = vector.load %arg10[%c0_3, %c0_4] : memref<8x32xf32, #tpu.memory_space<vmem>>, vector<8x32xf32>
    %cst = arith.constant dense<0.000000e+00> : vector<8x8xf32>
    %6 = tpu.matmul %5, %4, %cst {dimension_numbers = #tpu.dot_dimension_numbers<[1], [1], [0], [0], [0, 0, 1, 0], [], []>} : vector<8x32xf32>, vector<8x32xf32>, vector<8x8xf32> -> vector<8x8xf32>
    %c0_5 = arith.constant 0 : index
    %c0_6 = arith.constant 0 : index
    %c0_7 = arith.constant 0 : index
    %7 = vector.load %arg5[%c0_5, %c0_6, %c0_7] : memref<1x8x32xf32, #tpu.memory_space<vmem>>, vector<1x8x32xf32>
    %8 = vector.shape_cast %7 : vector<1x8x32xf32> to vector<8x32xf32>
    %c0_8 = arith.constant 0 : index
    %c0_9 = arith.constant 0 : index
    %9 = vector.load %arg7[%c0_8, %c0_9] : memref<8x1xf32, #tpu.memory_space<vmem>>, vector<8x1xf32>
    %cst_10 = arith.constant dense<0xFF800000> : vector<8xf32>
    %10 = vector.multi_reduction <maximumf>, %6, %cst_10 [1] : vector<8x8xf32> to vector<8xf32>
    %11 = vector.shape_cast %10 : vector<8xf32> to vector<8x1xf32>
    %12 = arith.maximumf %9, %11 : vector<8x1xf32>
    %13 = arith.subf %9, %12 : vector<8x1xf32>
    %14 = math.exp %13 : vector<8x1xf32>
    %15 = vector.broadcast %12 : vector<8x1xf32> to vector<8x8xf32>
    %16 = arith.subf %6, %15 : vector<8x8xf32>
    %17 = math.exp %16 : vector<8x8xf32>
    %c0_11 = arith.constant 0 : index
    %c0_12 = arith.constant 0 : index
    %18 = vector.load %arg8[%c0_11, %c0_12] : memref<8x1xf32, #tpu.memory_space<vmem>>, vector<8x1xf32>
    %19 = arith.mulf %14, %18 : vector<8x1xf32>
    %cst_13 = arith.constant dense<0.000000e+00> : vector<8xf32>
    %20 = vector.multi_reduction <add>, %17, %cst_13 [1] : vector<8x8xf32> to vector<8xf32>
    %21 = vector.shape_cast %20 : vector<8xf32> to vector<8x1xf32>
    %22 = arith.addf %19, %21 : vector<8x1xf32>
    %c0_14 = arith.constant 0 : index
    %c0_15 = arith.constant 0 : index
    %23 = vector.load %arg8[%c0_14, %c0_15] : memref<8x1xf32, #tpu.memory_space<vmem>>, vector<8x1xf32>
    tpu.vector_store %arg8[%c0_14, %c0_15], %22 {strides = array<i32>} : memref<8x1xf32, #tpu.memory_space<vmem>>, vector<8x1xf32>,
    %c0_16 = arith.constant 0 : index
    %c0_17 = arith.constant 0 : index
    %24 = vector.load %arg9[%c0_16, %c0_17] : memref<8x32xf32, #tpu.memory_space<vmem>>, vector<8x32xf32>
    %25 = vector.broadcast %14 : vector<8x1xf32> to vector<8x32xf32>
    %26 = arith.mulf %25, %24 : vector<8x32xf32>
    %cst_18 = arith.constant dense<0.000000e+00> : vector<8x32xf32>
    %27 = tpu.matmul %17, %8, %cst_18 {dimension_numbers = #tpu.dot_dimension_numbers<[1], [0], [0], [1], [0, 0, 1, 1], [], []>} : vector<8x8xf32>, vector<8x32xf32>, vector<8x32xf32> -> vector<8x32xf32>
    %28 = arith.addf %26, %27 : vector<8x32xf32>
    %c0_19 = arith.constant 0 : index
    %c0_20 = arith.constant 0 : index
    %29 = vector.load %arg9[%c0_19, %c0_20] : memref<8x32xf32, #tpu.memory_space<vmem>>, vector<8x32xf32>
    tpu.vector_store %arg9[%c0_19, %c0_20], %28 {strides = array<i32>} : memref<8x32xf32, #tpu.memory_space<vmem>>, vector<8x32xf32>,
    %c0_21 = arith.constant 0 : index
    %c0_22 = arith.constant 0 : index
    %30 = vector.load %arg7[%c0_21, %c0_22] : memref<8x1xf32, #tpu.memory_space<vmem>>, vector<8x1xf32>
    tpu.vector_store %arg7[%c0_21, %c0_22], %12 {strides = array<i32>} : memref<8x1xf32, #tpu.memory_space<vmem>>, vector<8x1xf32>,
    %c0_i32_23 = arith.constant 0 : i32
    %31 = arith.cmpi eq, %arg2, %c0_i32_23 : i32
    %32 = arith.extui %31 : i1 to i32
    %c0_i32_24 = arith.constant 0 : i32
    %33 = arith.cmpi ne, %32, %c0_i32_24 : i32
    scf.if %33 {
      %c0_25 = arith.constant 0 : index
      %c0_26 = arith.constant 0 : index
      %34 = vector.load %arg9[%c0_25, %c0_26] : memref<8x32xf32, #tpu.memory_space<vmem>>, vector<8x32xf32>
      %c0_27 = arith.constant 0 : index
      %c0_28 = arith.constant 0 : index
      %35 = vector.load %arg8[%c0_27, %c0_28] : memref<8x1xf32, #tpu.memory_space<vmem>>, vector<8x1xf32>
      %36 = vector.broadcast %35 : vector<8x1xf32> to vector<8x32xf32>
      %37 = arith.divf %34, %36 : vector<8x32xf32>
      %c0_29 = arith.constant 0 : index
      %c0_30 = arith.constant 0 : index
      %c0_31 = arith.constant 0 : index
      %38 = vector.load %arg6[%c0_29, %c0_30, %c0_31] : memref<1x8x32xf32, #tpu.memory_space<vmem>>, vector<1x8x32xf32>
      %39 = vector.shape_cast %38 : vector<1x8x32xf32> to vector<8x32xf32>
      %40 = vector.shape_cast %37 : vector<8x32xf32> to vector<1x8x32xf32>
      tpu.vector_store %arg6[%c0_29, %c0_30, %c0_31], %40 {strides = array<i32>} : memref<1x8x32xf32, #tpu.memory_space<vmem>>, vector<1x8x32xf32>,
    } else {
    }
    return
  }
  func.func @transform_0(%arg0: i32, %arg1: i32, %arg2: i32) -> (i32, i32, i32) {
    %c0_i32 = arith.constant 0 : i32
    %c0_i32_0 = arith.constant 0 : i32
    return %arg0, %arg1, %c0_i32 : i32, i32, i32
  }
  func.func @transform_1(%arg0: i32, %arg1: i32, %arg2: i32) -> (i32, i32, i32) {
    %c0_i32 = arith.constant 0 : i32
    %c0_i32_0 = arith.constant 0 : i32
    return %arg0, %arg2, %c0_i32 : i32, i32, i32
  }
  func.func @transform_2(%arg0: i32, %arg1: i32, %arg2: i32) -> (i32, i32, i32) {
    %c0_i32 = arith.constant 0 : i32
    %c0_i32_0 = arith.constant 0 : i32
    return %arg0, %arg2, %c0_i32 : i32, i32, i32
  }
  func.func @transform_3(%arg0: i32, %arg1: i32, %arg2: i32) -> (i32, i32, i32) {
    %c0_i32 = arith.constant 0 : i32
    %c0_i32_0 = arith.constant 0 : i32
    return %arg0, %arg1, %c0_i32 : i32, i32, i32
  }
}

</mosaic_0001>

<bundles_post_ra>
// kernel: tpu_custom_call.1
= control target key start
LH: loop header
LB: loop body
LE: loop exit
PB: predicated region body
PF: predicated region fallthrough
CT: control target
= control target key end

     0   :  { %s1042_s0 = inlined_call_operand.hbm [shape: f32[2,8,32], index: 0, kind: input, shape index: {}]   ;;  %s1043_s1 = inlined_call_operand.hbm [shape: f32[2,8,32], index: 1, kind: input, shape index: {}]   ;;  %s1044_s2 = inlined_call_operand.hbm [shape: f32[2,8,32], index: 2, kind: input, shape index: {}]   ;;  %s1045_s3 = inlined_call_operand.hbm [shape: f32[2,8,32], index: 3, kind: output, shape index: {}]  }
   0x1   :  { %1048 = sst [smem:[#allocation19_spill]] %s1043_s1 }
   0x2   :  { %8 = vsyncpa [#allocation7], 0 }
   0x3   :  { %10 = vsyncpa [#allocation7 + $0x1], 0 }
   0x4   :  { %11 = vsyncpa [#allocation10], 0 }
   0x5   :  { %13 = vsyncpa [#allocation10 + $0x1], 0 }
   0x6   :  { %14 = vsyncpa [#allocation8], 0 }
   0x7   :  { %16 = vsyncpa [#allocation8 + $0x1], 0  ;;  %s871_s12 = smov 0   ;;  %s873_s13 = smov 0  }
   0x8   :  { %s875_s14 = smov 0   ;;  %s877_s15 = smov 0  }
   0x9   :  { %s879_s16 = smov 0   ;;  %s881_s17 = smov 0  }
   0xa LB: > { %1049 = sst [smem:[#allocation16_spill]] %s842_s16  ;;  %s902_s18 = sadd.s32 4294967295, %s846_s17   ;;  %s846_s17 = sphi %s881_s17, %s22_s17   ;;  %s842_s16 = sphi %s879_s16, %s1061_s16   ;;  %s838_s15 = sphi %s877_s15, %s1060_s15   ;;  %s834_s14 = sphi %s875_s14, %s1064_s14   ;;  %s830_s13 = sphi %s873_s13, %s1063_s13   ;;  %s826_s12 = sphi %s871_s12, %s1062_s12  }
   0xb   : > { %s565_s19 = sadd.s32 4294967294, %s846_s17   ;;  %s41_s20 = sadd.s32 1, %s842_s16 }
   0xc   : > { %s50_s21 = sadd.s32 1, %s834_s14  ;;  %p43_p0 = scmp.ge.s32.totalorder %s41_s20, 2 }
   0xd   : > { %p57_p1 = scmp.ne.s32.totalorder %s834_s14, %s830_s13  ;;  %p58_p2 = scmp.eq.s32.totalorder %s846_s17, 0 }
   0xe   : > { %p63_p3 = scmp.ne.s32.totalorder %s830_s13, %s826_s12  ;;  %s1066_s20 = smov (%p43_p0, %s41_s20), 0 }
   0xf   : > { %1050 = sst [smem:[#allocation17_spill]] %s1066_s20  ;;  %p914_p4 = por %p58_p2, %p57_p1 }
  0x10   : > { %p64_p5 = scmp.eq.s32.totalorder %s902_s18, 0  ;;  %s45_s23 = ssub.s32 %s842_s16, %s1066_s20 }
  0x11   : > { %p145_p6 = scmp.eq.s32.totalorder %s902_s18, 1  ;;  %p48_p7 = scmp.eq.s32.totalorder %s45_s23, 0 }
  0x12   : > { %p922_p8 = por %p64_p5, %p63_p3  ;;  %p151_p10 = scmp.eq.s32.totalorder %s565_s19, 1 }
  0x13   : > { %p926_p9 = por %p145_p6, %p57_p1  ;;  %p567_p12 = scmp.ge.s32.totalorder %s846_s17, 2 }
  0x14   : > { %s931_s26 = scalar_select %p48_p7, %s834_s14, %s50_s21  }
  0x15   : > { %p933_p11 = por %p151_p10, %p63_p3  ;;  %p608_p13 = scmp.lt.s32.totalorder %s846_s17, 2 }
  0x16   : > { %1054 = sst [smem:[#allocation18_spill]] %s931_s26  ;;  %s171_s28 = sand.u32 1, %s834_s14  }
  0x17   : > { %s568_s29 = sshll.u32 %s171_s28, 3  ;;  %s569_s30 = sshll.u32 %s842_s16, 3 }
  0x18   : > { %p943_p0 = pnand %p608_p13, %p914_p4  ;;  %s191_s5 = sand.u32 1, %s846_s17  }
  0x19   : > { %s1057_s1 = sld [smem:[#allocation19_spill]]  ;;  %s195_s10 = scalar_lea.vmem [#allocation9], %s568_s29 }
  0x1a   : > { %s204_s11 = sshll.u32 %s195_s10, 4  ;;  %s192_s19 = scalar_lea.sflag [#allocation10], %s191_s5  ;;  %s205_s11 = int_to_ptr.vmem [resolvable:$true] %s204_s11 }
  0x1b   : > { %p574_p1 = scmp.ge.s32.totalorder %s846_s17, 1  ;;  %p229_p2 = scmp.lt.s32.totalorder %s846_s17, 3 }
  0x1c   : > { %s180_s6 = scalar_lea.hbm %s1042_s0, %s569_s30  ;;  %s172_s10 = scalar_lea.sflag [#allocation7], %s171_s28 }
  0x1d   : > { %p955_p3 = pnand %p574_p1, %p229_p2  ;;  %s182_s7 = sshll.u32 %s180_s6, 4  ;;  %s183_s7 = int_to_ptr.hbm [resolvable:$true] %s182_s7 }
  0x1e   : > { %s215_s16 = scalar_lea.vmem [#allocation11], %s568_s29  ;;  %s972_s22 = sand.u32 (!%p955_p3), 1, %s830_s13  }
  0x1f   : > { %s200_s8 = scalar_lea.hbm %s1057_s1, %s569_s30  ;;  %s224_s26 = sshll.u32 %s215_s16, 4  ;;  %s225_s26 = int_to_ptr.vmem [resolvable:$true] %s224_s26 }
  0x20   : > { %s202_s9 = sshll.u32 %s200_s8, 4  ;;  %s175_s8 = scalar_lea.vmem [#allocation6], %s568_s29  ;;  %s203_s9 = int_to_ptr.hbm [resolvable:$true] %s202_s9 }
  0x21   : > { %600 = dma.hbm_to_vmem [thread:$0]  (!%p943_p0), %s203_s9, 128, %s205_s11, %s192_s19  }
  0x22   : > { %s184_s1 = sshll.u32 %s175_s8, 4  ;;  %s220_s11 = scalar_lea.hbm %s1044_s2, %s569_s30  ;;  %s185_s1 = int_to_ptr.vmem [resolvable:$true] %s184_s1 }
  0x23   : > { %597 = dma.hbm_to_vmem [thread:$0]  (!%p943_p0), %s183_s7, 128, %s185_s1, %s172_s10  }
  0x24   : > { %s222_s20 = sshll.u32 %s220_s11, 4  ;;  %233 = sbr.rel (%p955_p3) target bundleno = 691 (0x2b3), region = 32  ;;  %s223_s20 = int_to_ptr.hbm [resolvable:$true] %s222_s20 }
  0x25   : > { %603 = dma.hbm_to_vmem [thread:$0]  (!%p943_p0), %s223_s20, 128, %s225_s26, %s192_s19  }
  0x26   : > { %s975_s1 = sshll.u32 (!%p955_p3), %s972_s22, 3  ;;  %s236_s28 = scalar_lea.sflag (!%p955_p3), [#allocation7], %s972_s22 }
  0x27   : > { %s239_s30 = scalar_lea.vmem (!%p955_p3), [#allocation6], %s975_s1 }
  0x29   : > { %813 = dma.done.wait (%p922_p8), %s236_s28, 128  }
  0x2a   : > { %815 = vsyncadd (%p922_p8), %s236_s28, 4294967168  ;;  %s245_s16 = sand.u32 1, %s902_s18   ;;  %s249_s26 = scalar_lea.vmem [#allocation9], %s975_s1 }
  0x2b   : > { %s246_s20 = scalar_lea.sflag [#allocation10], %s245_s16 }
  0x2c   : > { %817 = dma.done.wait (%p922_p8), %s246_s20, 256  }
  0x2d   : > { %819 = vsyncadd (%p922_p8), %s246_s20, 4294967040  ;;  %vm300_vm0 = vcmask 261120   ;;  %v848_v0 = vmov 0.0   ;;  %v302_v1 = vld [vmem:[%s239_s30] sm:$0xff]  ;;  %v305_v2 = vld [vmem:[%s249_s26] sm:$0xff]  ;;  %vm297_vm1 = vcmask 7168  }
  0x2e   : > { %301 = vst.msk [vmem:[#allocation4] sm:$0xff] %vm300_vm0, %v848_v0  ;;  %v303_v3 = vmul.f32 0.17677669, %v302_v1  ;;  %579 = vmatpush.xpose.msk.msra.mxu0 %vm300_vm0, %v305_v2  ;;  %v849_v5 = vmov -inf   ;;  %vm336_vm2 = vcmask 64512   ;;  %v850_v8 = vmov 0  }
  0x2f   : > { %298 = vst.msk [vmem:[#allocation2] sm:$0xff] %vm297_vm1, %v849_v5  ;;  %661 = vset.pattern.permute.xlu0 %v850_v8  ;;  %663 = vset.pattern.permute.xlu2 %v850_v8  ;;  %s259_s18 = scalar_lea.vmem [#allocation11], %s975_s1  ;;  %s583_s24 = sshll.u32 %s838_s15, 3 }
  0x30   : > { %304 = vst.msk [vmem:[#allocation5] sm:$0xff] %vm300_vm0, %v303_v3  ;;  %662 = vset.pattern.permute.xlu1 %v850_v8  ;;  %v334_v15 = vld [vmem:[%s259_s18] sm:$0xff]  ;;  %s431_s19 = scalar_lea.hbm %s1045_s3, %s583_s24  ;;  %s292_s21 = scalar_lea.vmem [#allocation12], %s975_s1 }
  0x31   : > { %299 = vst.msk [vmem:[#allocation3] sm:$0xff] %vm297_vm1, %v848_v0  ;;  %385 = vmatpush.msra.mxu1 %v334_v15  ;;  %s433_s23 = sshll.u32 %s292_s21, 4  ;;  %s435_s6 = sshll.u32 %s431_s19, 4  ;;  %s434_s23 = int_to_ptr.vmem [resolvable:$true] %s433_s23  ;;  %s436_s6 = int_to_ptr.hbm [resolvable:$true] %s435_s6 }
  0x32   : > { %s420_s15 = scalar_lea.sflag [#allocation8], %s972_s22  ;;  %s774_s7 = sshra.s32 %s436_s6, 4  ;;  %s775_s7 = int_to_ptr.hbm [resolvable:$true] %s774_s7 }
  0x33   : > { %s776_s8 = scalar_lea.hbm %s775_s7, 8  ;;  %s780_s9 = scalar_lea.hbm %s1045_s3, 16 }
  0x34   : > { %p777_p4 = scmp.ne.s32.totalorder %s775_s7, %s776_s8  ;;  %p781_p7 = scmp.lt.s32.totalorder %s775_s7, %s1045_s3 }
  0x35   : > { %v360_v25 = vld [vmem:[#allocation4] sm:$0xff]  ;;  %p782_p8 = scmp.lt.s32.totalorder %s780_s9, %s776_s8 }
  0x36   : > { %v335_v9 = vld [vmem:[#allocation2] sm:$0xff]  ;;  %p778_p5 = pnand %p777_p4, %p926_p9 }
  0x37   : > { %v306_v4 = vld [vmem:[#allocation5] sm:$0xff]  ;;  %p783_p10 = por %p782_p8, %p781_p7 }
  0x38   : > { %580 = vmatmul.msk.f32.vlgmr.msra.gmra.mxu0 %vm300_vm0, %v306_v4  ;;  %v352_v21 = vld [vmem:[#allocation3] sm:$0xff]  ;;  %p779_p6 = pneg %p778_p5 }
  0x3a   : > { %p784_p13 = pnand %p783_p10, %p779_p6 }
  0xb5   : > { %v331_v6 = vpop.f32.mrf.mxu0 }
  0xb6   : > { %v337_v7 = vsel %vm336_vm2, %v331_v6, -inf }
  0xb7   : > { %338 = vmax.xlane.f32.xlu0 %v337_v7 }
 0x12a   : > { %v339_v10 = vpop.xlane.xlu0 %338 }
 0x12b   : > { %v340_v11 = vmax.f32 %v335_v9, %v339_v10 }
 0x12d   : > { %v341_v12 = vsub.f32 %v335_v9, %v340_v11  ;;  %392 = vst.msk [vmem:[#allocation2] sm:$0xff] %vm297_vm1, %v340_v11  ;;  %346 = vperm.xlu0 %661, %v340_v11  }
 0x12f   : > { %v342_v13 = vmul.f32 1.442695, %v341_v12 }
 0x131   : > { %664 = vpow2.f32 %v342_v13 }
 0x137   : > { %v665_v14 = vpop.eup %664 }
 0x138   : > { %363 = vperm.xlu2 %663, %v665_v14   ;;  %v353_v22 = vmul.f32 %v665_v14, %v352_v21 }
 0x192   : > { %v364_v26 = vpop.permute.xlu2 %363 }
 0x193   : > { %v366_v27 = vmul.f32 %v364_v26, %v360_v25 }
 0x19f   : > { %v347_v16 = vpop.permute.xlu0 %346 }
 0x1a0   : > { %v349_v17 = vsub.f32 %v331_v6, %v347_v16 }
 0x1a2   : > { %v350_v18 = vmul.f32 1.442695, %v349_v17 }
 0x1a4   : > { %666 = vpow2.f32 %v350_v18 }
 0x1aa   : > { %v667_v19 = vpop.eup %666 }
 0x1ab   : > { %581 = vmatmul.msk.f32.vlgmr.msra.gmra.mxu1 %vm336_vm2, %v667_v19  ;;  %v354_v20 = vsel %vm336_vm2, %v667_v19, 0.0 }
 0x1ac   : > { %355 = vadd.xlane.f32.xlu1 %v354_v20 }
 0x21f   : > { %v356_v23 = vpop.xlane.xlu1 %355 }
 0x220   : > { %v357_v24 = vadd.f32 %v356_v23, %v353_v22 }
 0x222   : > { %359 = vst.msk [vmem:[#allocation3] sm:$0xff] %vm297_vm1, %v357_v24 }
 0x228   : > { %v387_v28 = vpop.f32.mrf.mxu1 }
 0x229   : > { %v390_v29 = vadd.f32 %v387_v28, %v366_v27  ;;  %v397_v30 = vld [vmem:[#allocation3] sm:$0xff] }
 0x22a   : > { %400 = vperm.xlu1 %662, %v397_v30  }
 0x22b   : > { %391 = vst.msk [vmem:[#allocation4] sm:$0xff] %vm300_vm0, %v390_v29 }
 0x232   : > { %v396_v41 = vld [vmem:[#allocation4] sm:$0xff] }
 0x29c   : > { %v401_v31 = vpop.permute.xlu1 %400 }
 0x29d   : > { %668 = vrcp.f32 %v401_v31  ;;  %v414_v35 = vand.u32 2147483648, %v401_v31  ;;  %v412_v37 = vand.u32 2147483647, %v401_v31  ;;  %vm408_vm4 = vweird.f32 %v401_v31 }
 0x29f   : > { %v415_v39 = vor.u32 1.1754944e-38, %v414_v35  ;;  %vm413_vm6 = vcmp.eq.f32.partialorder %v412_v37, 8.507059e+37 }
 0x2a3   : > { %v669_v32 = vpop.eup %668 }
 0x2a4   : > { %v404_v33 = vmul.f32 %v669_v32, %v401_v31  ;;  %vm409_vm3 = vweird.f32 %v669_v32 }
 0x2a5   : > { %vm410_vm5 = vmor %vm408_vm4, %vm409_vm3 }
 0x2a6   : > { %v405_v34 = vsub.f32 1.0, %v404_v33 }
 0x2a8   : > { %v406_v36 = vmul.f32 %v669_v32, %v405_v34 }
 0x2aa   : > { %v407_v38 = vadd.f32 %v669_v32, %v406_v36 }
 0x2ac   : > { %v411_v40 = vsel %vm410_vm5, %v669_v32, %v407_v38 }
 0x2ad   : > { %v416_v42 = vsel %vm413_vm6, %v415_v39, %v411_v40 }
 0x2ae   : > { %v417_v43 = vmul.f32 %v416_v42, %v396_v41 }
 0x2b0   : > { %418 = vst.msk [vmem:[%s292_s21] sm:$0xff] %vm300_vm0, %v417_v43 }
 0x2b1   : > { %787 = shalt.err (!%p784_p13)
}
 0x2b2   : > { %592 = dma.vmem_to_hbm [thread:$0]  (%p926_p9), %s434_s23, 128, %s436_s6, %s420_s15  }
 0x2b3 PF: > { %s447_s22 = sand.u32 1, %s826_s12   ;;  %p605_p0 = pnand %p567_p12, %p933_p11 }
 0x2b4   : > { %s448_s28 = scalar_lea.sflag [#allocation8], %s447_s22 }
 0x2b5   : > { %p606_p1 = pneg %p605_p0 }
 0x2b7   : > { %821 = dma.done.wait (%p606_p1), %s448_s28, 128  }
 0x2b8   : > { %823 = vsyncadd (%p606_p1), %s448_s28, 4294967168  ;;  %s22_s17 = sadd.s32 1, %s846_s17   ;;  %s1059_s30 = sld [smem:[#allocation18_spill]] }
 0x2b9   : > { %p19_p2 = scmp.ge.s32.totalorder %s22_s17, 4   ;;  %s1060_s15 = sld [smem:[#allocation16_spill]] }
 0x2ba   : > { %s1061_s16 = sld [smem:[#allocation17_spill]]  ;;  %s1062_s12 = smov %s830_s13 }
 0x2bb   : > { %s1063_s13 = smov %s834_s14  ;;  %21 = sbr.rel (!%p19_p2) target bundleno = 10 (0xa), region = 109 }
 0x2be   : > { %s1064_s14 = smov %s1059_s30 }
 0x2c0   :  { %454 = vsyncpa [#allocation7], 1 }
 0x2c1   :  { %456 = vsyncpa [#allocation7 + $0x1], 1 }
 0x2c2   :  { %457 = vsyncpa [#allocation10], 1 }
 0x2c3   :  { %459 = vsyncpa [#allocation10 + $0x1], 1 }
 0x2c4   :  { %460 = vsyncpa [#allocation8], 1 }
 0x2c5   :  { %462 = vsyncpa [#allocation8 + $0x1], 1 }

</bundles_post_ra>
